<compile_context>
chip_gen: v7x
topology: tpu7x:2x2x1
jax: 0.10.0
libtpu: 0.0.40
codegen_flags: <defaults>
</compile_context>

<pallas_src>
import functools

import jax
import jax.numpy as jnp
from jax import lax
from jax.experimental import pallas as pl
from jax.experimental.pallas import tpu as pltpu

_LANES = 128
_SUBLANES = 8
_LOG_CLAMP = -100.0            # torch F.binary_cross_entropy clamps log at -100
_MAX_BLOCK_ROWS = 4096         # 4096*128*4B = 2 MiB per f32 input block


# ----------------------------- elementwise terms -----------------------------

def _bce_elem(p, t):
    """Per-element binary cross entropy, matching F.binary_cross_entropy."""
    log_p = jnp.maximum(jnp.log(p), _LOG_CLAMP)
    log_1mp = jnp.maximum(jnp.log(1.0 - p), _LOG_CLAMP)
    return -(t * log_p + (1.0 - t) * log_1mp)


# --------------------------------- kernel ------------------------------------

def _vae_loss_kernel(xr_ref, xt_ref, mu_ref, lv_ref, bce_out_ref, kl_out_ref,
                     *, valid_rows, needs_mask):
    """One grid step:
      * BCE over a lane-dense (block_rows, 128) tile -> (1, 128) sublane partial.
      * KL over the resident latent tile, only at grid step 0.
    All other KL output blocks are written as zeros, so every output block is
    owned by exactly one grid step (safe under "parallel" semantics)."""
    g = pl.program_id(0)
    last = pl.num_programs(0) - 1

    def bce_partial(mask_tail):
        p = xr_ref[...].astype(jnp.float32)
        t = xt_ref[...].astype(jnp.float32)
        val = _bce_elem(p, t)
        if mask_tail:
            # Block-relative row mask for the single partial tail block
            # (rows past `valid_rows` are unspecified out-of-bounds reads).
            row = lax.broadcasted_iota(jnp.int32, val.shape, 0)
            val = jnp.where(row < valid_rows, val, 0.0)
        return jnp.sum(val, axis=0, keepdims=True)      # (1, 128)

    if needs_mask:
        @pl.when(g == last)
        def _():
            bce_out_ref[...] = bce_partial(True)

        @pl.when(g != last)
        def _():
            bce_out_ref[...] = bce_partial(False)
    else:
        bce_out_ref[...] = bce_partial(False)

    @pl.when(g == 0)
    def _():
        mu = mu_ref[...].astype(jnp.float32)
        lv = lv_ref[...].astype(jnp.float32)
        kl = 1.0 + lv - mu * mu - jnp.exp(lv)
        kl_out_ref[...] = jnp.sum(kl, axis=0, keepdims=True)   # (1, 128)

    @pl.when(g != 0)
    def _():
        kl_out_ref[...] = jnp.zeros_like(kl_out_ref)


# ------------------------------ host-side wrap --------------------------------

def _to_lane_rows(x, pad_value):
    """Flatten to a lane-dense (rows, 128) view.  Zero-copy reshape when
    x.size % 128 == 0; otherwise pad only the tail (pad_value chosen so the
    elementwise term contributes exactly 0)."""
    flat = x.reshape(-1)
    n = flat.shape[0]
    if n % _LANES == 0:
        return flat.reshape(n // _LANES, _LANES)
    pad = _LANES - (n % _LANES)
    flat = jnp.concatenate([flat, jnp.full((pad,), pad_value, dtype=flat.dtype)])
    return flat.reshape((n + pad) // _LANES, _LANES)


def _prep_latent(x):
    """Pad the (tiny) latent tensor to one lane-dense (kl_rows, 128) tile.
    Pad value 0 contributes exactly 0 to the KL sum: 1 + 0 - 0 - exp(0) = 0."""
    flat = x.reshape(-1)
    n = flat.shape[0]
    kl_rows = max(_SUBLANES, pl.cdiv(pl.cdiv(n, _LANES), _SUBLANES) * _SUBLANES)
    pad = kl_rows * _LANES - n
    if pad:
        flat = jnp.concatenate([flat, jnp.zeros((pad,), dtype=flat.dtype)])
    return flat.reshape(kl_rows, _LANES)


def vae_loss_pallas(x_reconstructed, x_input, mu, lnvar, alpha: float = 0.1):
    """Pallas equivalent of VAELoss.forward."""
    assert x_reconstructed.shape == x_input.shape
    assert mu.shape == lnvar.shape

    n = int(x_reconstructed.size)
    kl_n = int(mu.size)

    # Lane-dense views, native dtype (cast to f32 inside the kernel).
    xr = _to_lane_rows(x_reconstructed, 1.0)   # p = 1 -> 0 BCE contribution
    xt = _to_lane_rows(x_input, 1.0)           # t = 1 -> 0 BCE contribution
    rows = xr.shape[0]

    # Big blocks for HBM roofline, but aim for a grid of >= 2 steps so both
    # v7x TensorCores get work when the tensor allows it.
    block_rows = min(
        _MAX_BLOCK_ROWS,
        max(_SUBLANES, pl.cdiv(pl.cdiv(rows, 2), _SUBLANES) * _SUBLANES))
    grid = pl.cdiv(rows, block_rows)
    valid_rows = rows - (grid - 1) * block_rows
    needs_mask = valid_rows < block_rows

    # TODO(synk): if the latent tensor were too large to keep resident in VMEM,
    # fall back to a second blocked reduction instead of a resident tile.
    mu2 = _prep_latent(mu)
    lv2 = _prep_latent(lnvar)
    kl_rows = mu2.shape[0]

    kern = functools.partial(_vae_loss_kernel,
                             valid_rows=valid_rows, needs_mask=needs_mask)

    bce_part, kl_part = pl.pallas_call(
        kern,
        grid=(grid,),
        in_specs=[
            pl.BlockSpec((block_rows, _LANES), lambda g: (g, 0)),
            pl.BlockSpec((block_rows, _LANES), lambda g: (g, 0)),
            pl.BlockSpec((kl_rows, _LANES), lambda g: (0, 0)),   # resident
            pl.BlockSpec((kl_rows, _LANES), lambda g: (0, 0)),   # resident
        ],
        out_specs=(
            pl.BlockSpec((None, 1, _LANES), lambda g: (g, 0, 0)),
            pl.BlockSpec((None, 1, _LANES), lambda g: (g, 0, 0)),
        ),
        out_shape=(
            jax.ShapeDtypeStruct((grid, 1, _LANES), jnp.float32),
            jax.ShapeDtypeStruct((grid, 1, _LANES), jnp.float32),
        ),
        compiler_params=pltpu.CompilerParams(
            dimension_semantics=("parallel",),
            vmem_limit_bytes=32 * 1024 * 1024),
    )(xr, xt, mu2, lv2)

    rec = jnp.sum(bce_part) / n
    kl = -0.5 * (jnp.sum(kl_part) / kl_n)
    return rec + alpha * kl


# ------------------------------ pure-JAX reference ----------------------------

def vae_loss_reference(x_reconstructed, x_input, mu, lnvar, alpha: float = 0.1):
    """Mirrors the PyTorch VAELoss.forward for validation."""
    p = x_reconstructed.astype(jnp.float32)
    t = x_input.astype(jnp.float32)
    log_p = jnp.maximum(jnp.log(p), _LOG_CLAMP)
    log_1mp = jnp.maximum(jnp.log(1.0 - p), _LOG_CLAMP)
    rec = jnp.mean(-(t * log_p + (1.0 - t) * log_1mp))
    kl = -0.5 * jnp.mean(1.0 + lnvar - mu ** 2 - jnp.exp(lnvar))
    return rec + alpha * kl


# ----------------------------------- main -------------------------------------

if __name__ == "__main__":
    key = jax.random.PRNGKey(0)
    k1, k2, k3, k4 = jax.random.split(key, 4)

    N, C, H, W = 2, 4, 16, 16   # reconstruction / input shape
    LATENT = 32                 # latent dimension for mu / lnvar
    ALPHA = 0.1

    # x_reconstructed must be in (0, 1) (output of a sigmoid decoder);
    # x_input is the target image in [0, 1].
    x_rec = jax.nn.sigmoid(jax.random.normal(k1, (N, C, H, W), dtype=jnp.float32))
    x_in = jax.random.uniform(k2, (N, C, H, W), dtype=jnp.float32)
    mu = jax.random.normal(k3, (N, LATENT), dtype=jnp.float32)
    lnvar = 0.1 * jax.random.normal(k4, (N, LATENT), dtype=jnp.float32)

    loss = jax.block_until_ready(vae_loss_pallas(x_rec, x_in, mu, lnvar, alpha=ALPHA))

    ref = vae_loss_reference(x_rec, x_in, mu, lnvar, alpha=ALPHA)
    assert jnp.allclose(loss, ref, atol=1e-5, rtol=1e-5), (loss, ref)

    print("KERNEL_OK")
</pallas_src>

<mosaic_0001>
module attributes {stable_mosaic.version = 11 : i64} {
  func.func @_vae_loss_kernel(%arg0: i32, %arg1: memref<8x128xf32, #tpu.memory_space<vmem>>, %arg2: memref<8x128xf32, #tpu.memory_space<vmem>>, %arg3: memref<8x128xf32, #tpu.memory_space<vmem>>, %arg4: memref<8x128xf32, #tpu.memory_space<vmem>>, %arg5: memref<1x1x128xf32, #tpu.memory_space<vmem>>, %arg6: memref<1x1x128xf32, #tpu.memory_space<vmem>>) attributes {dimension_semantics = [#tpu.dimension_semantics<parallel>], iteration_bounds = array<i64: 2>, scalar_prefetch = 0 : i64, scratch_operands = 0 : i64, tpu.core_type = #tpu.core_type<tc>, window_params = [{transform_indices = @transform_0, window_bounds = array<i64: 8, 128>}, {transform_indices = @transform_1, window_bounds = array<i64: 8, 128>}, {pipeline_mode = #tpu.pipeline_mode<synchronous>, transform_indices = @transform_2, window_bounds = array<i64: 8, 128>}, {pipeline_mode = #tpu.pipeline_mode<synchronous>, transform_indices = @transform_3, window_bounds = array<i64: 8, 128>}, {transform_indices = @transform_4, window_bounds = array<i64: 1, 1, 128>}, {transform_indices = @transform_5, window_bounds = array<i64: 1, 1, 128>}]} {
    %c0 = arith.constant 0 : index
    %c0_0 = arith.constant 0 : index
    %0 = vector.load %arg1[%c0, %c0_0] : memref<8x128xf32, #tpu.memory_space<vmem>>, vector<8x128xf32>
    %c0_1 = arith.constant 0 : index
    %c0_2 = arith.constant 0 : index
    %1 = vector.load %arg2[%c0_1, %c0_2] : memref<8x128xf32, #tpu.memory_space<vmem>>, vector<8x128xf32>
    %2 = math.log %0 : vector<8x128xf32>
    %cst = arith.constant -1.000000e+02 : f32
    %3 = vector.broadcast %cst : f32 to vector<8x128xf32>
    %4 = arith.maximumf %2, %3 : vector<8x128xf32>
    %cst_3 = arith.constant 1.000000e+00 : f32
    %5 = vector.broadcast %cst_3 : f32 to vector<8x128xf32>
    %6 = arith.subf %5, %0 : vector<8x128xf32>
    %7 = math.log %6 : vector<8x128xf32>
    %cst_4 = arith.constant -1.000000e+02 : f32
    %8 = vector.broadcast %cst_4 : f32 to vector<8x128xf32>
    %9 = arith.maximumf %7, %8 : vector<8x128xf32>
    %10 = arith.mulf %1, %4 : vector<8x128xf32>
    %cst_5 = arith.constant 1.000000e+00 : f32
    %11 = vector.broadcast %cst_5 : f32 to vector<8x128xf32>
    %12 = arith.subf %11, %1 : vector<8x128xf32>
    %13 = arith.mulf %12, %9 : vector<8x128xf32>
    %14 = arith.addf %10, %13 : vector<8x128xf32>
    %cst_6 = arith.constant 0.000000e+00 : f32
    %15 = vector.broadcast %cst_6 : f32 to vector<8x128xf32>
    %16 = arith.subf %15, %14 : vector<8x128xf32>
    %cst_7 = arith.constant dense<0.000000e+00> : vector<128xf32>
    %17 = vector.multi_reduction <add>, %16, %cst_7 [0] : vector<8x128xf32> to vector<128xf32>
    %18 = vector.shape_cast %17 : vector<128xf32> to vector<1x128xf32>
    %c0_8 = arith.constant 0 : index
    %c0_9 = arith.constant 0 : index
    %c0_10 = arith.constant 0 : index
    %19 = vector.load %arg5[%c0_8, %c0_9, %c0_10] : memref<1x1x128xf32, #tpu.memory_space<vmem>>, vector<1x1x128xf32>
    %20 = vector.shape_cast %19 : vector<1x1x128xf32> to vector<1x128xf32>
    %21 = vector.shape_cast %18 : vector<1x128xf32> to vector<1x1x128xf32>
    tpu.vector_store %arg5[%c0_8, %c0_9, %c0_10], %21 {strides = array<i32>} : memref<1x1x128xf32, #tpu.memory_space<vmem>>, vector<1x1x128xf32>,
    %c0_i32 = arith.constant 0 : i32
    %22 = arith.cmpi eq, %arg0, %c0_i32 : i32
    %23 = arith.extui %22 : i1 to i32
    %c0_i32_11 = arith.constant 0 : i32
    %24 = arith.cmpi ne, %23, %c0_i32_11 : i32
    scf.if %24 {
      %c0_14 = arith.constant 0 : index
      %c0_15 = arith.constant 0 : index
      %28 = vector.load %arg3[%c0_14, %c0_15] : memref<8x128xf32, #tpu.memory_space<vmem>>, vector<8x128xf32>
      %c0_16 = arith.constant 0 : index
      %c0_17 = arith.constant 0 : index
      %29 = vector.load %arg4[%c0_16, %c0_17] : memref<8x128xf32, #tpu.memory_space<vmem>>, vector<8x128xf32>
      %cst_18 = arith.constant 1.000000e+00 : f32
      %30 = vector.broadcast %cst_18 : f32 to vector<8x128xf32>
      %31 = arith.addf %30, %29 : vector<8x128xf32>
      %32 = arith.mulf %28, %28 : vector<8x128xf32>
      %33 = arith.subf %31, %32 : vector<8x128xf32>
      %34 = math.exp %29 : vector<8x128xf32>
      %35 = arith.subf %33, %34 : vector<8x128xf32>
      %cst_19 = arith.constant dense<0.000000e+00> : vector<128xf32>
      %36 = vector.multi_reduction <add>, %35, %cst_19 [0] : vector<8x128xf32> to vector<128xf32>
      %37 = vector.shape_cast %36 : vector<128xf32> to vector<1x128xf32>
      %c0_20 = arith.constant 0 : index
      %c0_21 = arith.constant 0 : index
      %c0_22 = arith.constant 0 : index
      %38 = vector.load %arg6[%c0_20, %c0_21, %c0_22] : memref<1x1x128xf32, #tpu.memory_space<vmem>>, vector<1x1x128xf32>
      %39 = vector.shape_cast %38 : vector<1x1x128xf32> to vector<1x128xf32>
      %40 = vector.shape_cast %37 : vector<1x128xf32> to vector<1x1x128xf32>
      tpu.vector_store %arg6[%c0_20, %c0_21, %c0_22], %40 {strides = array<i32>} : memref<1x1x128xf32, #tpu.memory_space<vmem>>, vector<1x1x128xf32>,
    } else {
    }
    %c0_i32_12 = arith.constant 0 : i32
    %25 = arith.cmpi ne, %arg0, %c0_i32_12 : i32
    %26 = arith.extui %25 : i1 to i32
    %c0_i32_13 = arith.constant 0 : i32
    %27 = arith.cmpi ne, %26, %c0_i32_13 : i32
    scf.if %27 {
      %cst_14 = arith.constant 0.000000e+00 : f32
      %28 = vector.broadcast %cst_14 : f32 to vector<1x128xf32>
      %c0_15 = arith.constant 0 : index
      %c0_16 = arith.constant 0 : index
      %c0_17 = arith.constant 0 : index
      %29 = vector.load %arg6[%c0_15, %c0_16, %c0_17] : memref<1x1x128xf32, #tpu.memory_space<vmem>>, vector<1x1x128xf32>
      %30 = vector.shape_cast %29 : vector<1x1x128xf32> to vector<1x128xf32>
      %31 = vector.shape_cast %28 : vector<1x128xf32> to vector<1x1x128xf32>
      tpu.vector_store %arg6[%c0_15, %c0_16, %c0_17], %31 {strides = array<i32>} : memref<1x1x128xf32, #tpu.memory_space<vmem>>, vector<1x1x128xf32>,
    } else {
    }
    return
  }
  func.func @transform_0(%arg0: i32) -> (i32, i32) {
    %c0_i32 = arith.constant 0 : i32
    %c0_i32_0 = arith.constant 0 : i32
    return %arg0, %c0_i32 : i32, i32
  }
  func.func @transform_1(%arg0: i32) -> (i32, i32) {
    %c0_i32 = arith.constant 0 : i32
    %c0_i32_0 = arith.constant 0 : i32
    return %arg0, %c0_i32 : i32, i32
  }
  func.func @transform_2(%arg0: i32) -> (i32, i32) {
    %c0_i32 = arith.constant 0 : i32
    %c0_i32_0 = arith.constant 0 : i32
    %c0_i32_1 = arith.constant 0 : i32
    return %c0_i32, %c0_i32_0 : i32, i32
  }
  func.func @transform_3(%arg0: i32) -> (i32, i32) {
    %c0_i32 = arith.constant 0 : i32
    %c0_i32_0 = arith.constant 0 : i32
    %c0_i32_1 = arith.constant 0 : i32
    return %c0_i32, %c0_i32_0 : i32, i32
  }
  func.func @transform_4(%arg0: i32) -> (i32, i32, i32) {
    %c0_i32 = arith.constant 0 : i32
    %c0_i32_0 = arith.constant 0 : i32
    %c0_i32_1 = arith.constant 0 : i32
    return %arg0, %c0_i32, %c0_i32_0 : i32, i32, i32
  }
  func.func @transform_5(%arg0: i32) -> (i32, i32, i32) {
    %c0_i32 = arith.constant 0 : i32
    %c0_i32_0 = arith.constant 0 : i32
    %c0_i32_1 = arith.constant 0 : i32
    return %arg0, %c0_i32, %c0_i32_0 : i32, i32, i32
  }
}

</mosaic_0001>

<bundles_post_ra>
// kernel: tpu_custom_call.1
= control target key start
LH: loop header
LB: loop body
LE: loop exit
PB: predicated region body
PF: predicated region fallthrough
CT: control target
= control target key end

     0   :  { %s1094_s0 = inlined_call_operand.hbm [shape: f32[16,128], index: 0, kind: input, shape index: {}]   ;;  %s1095_s1 = inlined_call_operand.hbm [shape: f32[16,128], index: 1, kind: input, shape index: {}]   ;;  %s1096_s2 = inlined_call_operand.hbm [shape: f32[8,128], index: 2, kind: input, shape index: {}]   ;;  %s1097_s3 = inlined_call_operand.vmem [shape: f32[8,128], index: 3, kind: input, shape index: {}]   ;;  %s1098_s4 = inlined_call_operand.hbm [shape: f32[2,1,128], index: 4, kind: output, shape index: {0}]   ;;  %s1099_s5 = inlined_call_operand.hbm [shape: f32[2,1,128], index: 5, kind: output, shape index: {1}]  }
   0x1   :  { %1104 = sst [smem:[#allocation17_spill]] %s1096_s2 }
   0x2   :  { %11 = vsyncpa [#allocation3], 0 }
   0x3   :  { %13 = vsyncpa [#allocation3 + $0x1], 0 }
   0x4   :  { %14 = vsyncpa [#allocation6], 0 }
   0x5   :  { %16 = vsyncpa [#allocation6 + $0x1], 0 }
   0x6   :  { %17 = vsyncpa [#allocation4], 0 }
   0x7   :  { %19 = vsyncpa [#allocation4 + $0x1], 0 }
   0x8   :  { %20 = vsyncpa [#allocation10], 0 }
   0x9   :  { %22 = vsyncpa [#allocation10 + $0x1], 0  ;;  %s823_s18 = smov 0   ;;  %s825_s19 = smov 0  }
   0xa   :  { %s827_s20 = smov 0   ;;  %s829_s21 = smov 0  }
   0xb LB: > { %s844_s22 = sadd.s32 4294967295, %s785_s21   ;;  %s499_s23 = sadd.s32 4294967294, %s785_s21   ;;  %s785_s21 = sphi %s829_s21, %s1131_s21   ;;  %s781_s20 = sphi %s827_s20, %s1130_s20   ;;  %s777_s19 = sphi %s825_s19, %s1129_s19   ;;  %s773_s18 = sphi %s823_s18, %s1128_s18  }
   0xc   : > { %p48_p0 = scmp.ne.s32.totalorder %s777_s19, %s773_s18  ;;  %p1100_p1 = scmp.eq.s32.totalorder %s844_s22, 0 }
   0xd   : > { %p146_p3 = scmp.eq.s32.totalorder %s499_s23, 1  ;;  %p500_p5 = scmp.ge.s32.totalorder %s785_s21, 1 }
   0xe   : > { %p853_p4 = por %p1100_p1, %p48_p0  ;;  %p179_p7 = scmp.lt.s32.totalorder %s785_s21, 3 }
   0xf   : > { %p858_p6 = por %p146_p3, %p48_p0  ;;  %s787_s27 = smov [#allocation7]  }
  0x10   : > { %s1105_s24 = scalar_select %p853_p4, 1, 0 }
  0x11   : > { %s1106_s25 = scalar_select %p858_p6, 1, 0 }
  0x12   : > { %p864_p9 = pnand %p500_p5, %p179_p7  ;;  %s192_s28 = sshll.u32 %s787_s27, 4  ;;  %s193_s28 = int_to_ptr.vmem [resolvable:$true] %s192_s28 }
  0x13   : > { %s872_s29 = sadd.s32 1, %s785_s21   ;;  %s35_s8 = sadd.s32 1, %s781_s20 }
  0x14   : > { %s1107_s26 = scalar_select %p864_p9, 1, 0 }
  0x15   : > { %p529_p11 = pneg %p864_p9  ;;  %s32_s6 = ssub.s32 %s785_s21, %s872_s29 }
  0x16   : > { %p882_p13 = scmp.eq.s32.totalorder %s32_s6, 0  ;;  %s1110_s2 = sld [smem:[#allocation17_spill]] }
  0x17   : > { %p876_p12 = pnand %p529_p11, %p1100_p1 }
  0x18   : > { %s1109_s7 = scalar_select %p882_p13, 1, 0 }
  0x19   : > { %p593_p5 = pneg %p876_p12 }
  0x1c   : > { %s591_s11 = scalar_lea.hbm %s1110_s2, 128 }
  0x1d   : > { %p592_p3 = scmp.ne.s32.totalorder %s1110_s2, %s591_s11  ;;  %p598_p10 = scmp.lt.u32.totalorder %s591_s11, %s1110_s2 }
  0x1f   : > { %p594_p7 = pnand %p593_p5, %p592_p3 }
  0x21   : > { %p595_p11 = pneg %p594_p7 }
  0x23   : > { %p600_p8 = pnand %p598_p10, %p595_p11 }
  0x25   : > { %603 = shalt.err (!%p600_p8)
}
  0x26   : > { %s604_s16 = scalar_lea.vmem %s193_s28, 128  ;;  %p612_p6 = scmp.lt.s32.totalorder %s193_s28, %s193_s28 }
  0x27   : > { %p605_p1 = scmp.ne.s32.totalorder %s193_s28, %s604_s16  ;;  %p613_p4 = scmp.lt.s32.totalorder %s604_s16, %s604_s16 }
  0x29   : > { %p607_p2 = pnand %p605_p1, %p593_p5  ;;  %p614_p9 = por %p613_p4, %p612_p6 }
  0x2b   : > { %p608_p0 = pneg %p607_p2 }
  0x2d   : > { %p615_p13 = pnand %p614_p9, %p608_p0 }
  0x2f   : > { %618 = shalt.err (!%p615_p13)
}
  0x30   : > { %532 = dma.hbm_to_vmem [thread:$0]  (!%p876_p12), %s1110_s2, 128, %s193_s28, [#allocation6]  }
  0x31   : > { %p1111_p1 = scmp.ne.s32.totalorder %s1109_s7, 0  ;;  %p43_p2 = scmp.eq.s32.totalorder %s785_s21, 0 }
  0x32   : > { %p1113_p4 = scmp.ne.s32.totalorder %s781_s20, %s777_s19  ;;  %p1114_p6 = scmp.eq.s32.totalorder %s844_s22, 1 }
  0x33   : > { %s908_s27 = scalar_select %p1111_p1, %s781_s20, %s35_s8  }
  0x34   : > { %p916_p8 = por %p1114_p6, %p1113_p4  ;;  %p548_p9 = scmp.lt.s32.totalorder %s785_s21, 2 }
  0x35   : > { %1112 = sst [smem:[#allocation16_spill]] %s908_s27  ;;  %s206_s6 = sand.u32 1, %s781_s20  }
  0x36   : > { %s1115_s30 = scalar_select %p916_p8, 1, 0 }
  0x37   : > { %p1116_p10 = pmov %p1113_p4  ;;  %s925_s9 = sshll.u32 %s206_s6, 3 }
  0x38   : > { %s504_s10 = sshll.u32 %s785_s21, 7  ;;  %s210_s8 = scalar_lea.vmem [#allocation2], %s925_s9 }
  0x39   : > { %p44_p13 = por %p43_p2, %p1116_p10  ;;  %s931_s7 = scalar_lea.hbm %s1094_s0, %s504_s10 }
  0x3a   : > { %s217_s12 = sshll.u32 %s210_s8, 4  ;;  %s943_s16 = scalar_lea.hbm %s1095_s1, %s504_s10  ;;  %s938_s12 = int_to_ptr.vmem [resolvable:$true] %s217_s12 }
  0x3b   : > { %p934_p12 = pnand %p548_p9, %p44_p13  ;;  %s207_s17 = scalar_lea.sflag [#allocation3], %s206_s6 }
  0x3c   : > { %s619_s23 = scalar_lea.hbm %s931_s7, 128  ;;  %s624_s8 = scalar_lea.hbm %s1094_s0, 256 }
  0x3d   : > { %p620_p0 = scmp.ne.s32.totalorder %s931_s7, %s619_s23  ;;  %p621_p3 = pneg %p934_p12 }
  0x3e   : > { %p625_p11 = scmp.lt.u32.totalorder %s931_s7, %s1094_s0  ;;  %p626_p1 = scmp.lt.u32.totalorder %s624_s8, %s619_s23 }
  0x3f   : > { %p622_p5 = pnand %p621_p3, %p620_p0  ;;  %p628_p4 = scmp.lt.u32.totalorder %s619_s23, %s931_s7 }
  0x40   : > { %p627_p2 = por %p626_p1, %p625_p11 }
  0x41   : > { %p623_p7 = pneg %p622_p5 }
  0x42   : > { %p629_p6 = por %p628_p4, %p627_p2 }
  0x44   : > { %p630_p9 = pnand %p629_p6, %p623_p7 }
  0x46   : > { %633 = shalt.err (!%p630_p9)
}
  0x47   : > { %s634_s6 = scalar_lea.vmem %s938_s12, 128  ;;  %s788_s10 = smov [#allocation2]  }
  0x48   : > { %p635_p10 = scmp.ne.s32.totalorder %s938_s12, %s634_s6  ;;  %s639_s14 = sshll.u32 %s788_s10, 4  ;;  %s640_s14 = int_to_ptr.vmem [resolvable:$false] %s639_s14 }
  0x49   : > { %s641_s2 = scalar_lea.vmem %s640_s14, 256  ;;  %p642_p5 = scmp.lt.s32.totalorder %s938_s12, %s640_s14 }
  0x4a   : > { %p637_p13 = pnand %p635_p10, %p621_p3  ;;  %p643_p11 = scmp.lt.s32.totalorder %s641_s2, %s634_s6 }
  0x4c   : > { %p638_p0 = pneg %p637_p13  ;;  %p644_p1 = por %p643_p11, %p642_p5 }
  0x4e   : > { %p645_p2 = pnand %p644_p1, %p638_p0 }
  0x50   : > { %648 = shalt.err (!%p645_p2)
}
  0x51   : > { %536 = dma.hbm_to_vmem [thread:$0]  (!%p934_p12), %s931_s7, 128, %s938_s12, %s207_s17  }
  0x52   : > { %s224_s27 = sand.u32 1, %s785_s21   ;;  %s228_s15 = scalar_lea.vmem [#allocation5], %s925_s9 }
  0x53   : > { %s235_s23 = sshll.u32 %s228_s15, 4  ;;  %s225_s11 = scalar_lea.sflag [#allocation6], %s224_s27  ;;  %s236_s23 = int_to_ptr.vmem [resolvable:$true] %s235_s23 }
  0x54   : > { %s649_s28 = scalar_lea.hbm %s943_s16, 128  ;;  %s654_s10 = scalar_lea.hbm %s1095_s1, 256 }
  0x55   : > { %p650_p7 = scmp.ne.s32.totalorder %s943_s16, %s649_s28  ;;  %p655_p9 = scmp.lt.u32.totalorder %s943_s16, %s1095_s1 }
  0x56   : > { %p656_p10 = scmp.lt.u32.totalorder %s654_s10, %s649_s28  ;;  %p658_p0 = scmp.lt.u32.totalorder %s649_s28, %s943_s16 }
  0x57   : > { %p652_p4 = pnand %p650_p7, %p621_p3 }
  0x58   : > { %p657_p13 = por %p656_p10, %p655_p9 }
  0x59   : > { %p653_p6 = pneg %p652_p4 }
  0x5a   : > { %p659_p5 = por %p658_p0, %p657_p13 }
  0x5c   : > { %p660_p11 = pnand %p659_p5, %p653_p6 }
  0x5e   : > { %663 = shalt.err (!%p660_p11)
}
  0x5f   : > { %s664_s9 = scalar_lea.vmem %s236_s23, 128  ;;  %s789_s7 = smov [#allocation5]  }
  0x60   : > { %p665_p1 = scmp.ne.s32.totalorder %s236_s23, %s664_s9  ;;  %s669_s12 = sshll.u32 %s789_s7, 4  ;;  %s670_s12 = int_to_ptr.vmem [resolvable:$false] %s669_s12 }
  0x61   : > { %s671_s17 = scalar_lea.vmem %s670_s12, 256  ;;  %p672_p4 = scmp.lt.s32.totalorder %s236_s23, %s670_s12 }
  0x62   : > { %p667_p2 = pnand %p665_p1, %p621_p3  ;;  %p673_p8 = scmp.lt.s32.totalorder %s671_s17, %s664_s9 }
  0x64   : > { %p668_p7 = pneg %p667_p2  ;;  %p674_p9 = por %p673_p8, %p672_p4 }
  0x66   : > { %p675_p10 = pnand %p674_p9, %p668_p7 }
  0x68   : > { %678 = shalt.err (!%p675_p10)
}
  0x69   : > { %539 = dma.hbm_to_vmem [thread:$0]  (!%p934_p12), %s943_s16, 128, %s236_s23, %s225_s11  }
  0x6a   : > { %p1118_p6 = scmp.ne.s32.totalorder %s1107_s26, 0 }
  0x6b   : > { %s994_s27 = sand.u32 (!%p1118_p6), 1, %s777_s19   ;;  %p1119_p3 = scmp.ne.s32.totalorder (!%p1118_p6), %s1105_s24, 0 }
  0x6c   : > { %244 = sbr.rel (%p1118_p6) target bundleno = 217 (0xd9), region = 36  ;;  %s508_s15 = sshll.u32 (!%p1118_p6), %s994_s27, 3 }
  0x6d   : > { %s247_s28 = scalar_lea.sflag (!%p1118_p6), [#allocation3], %s994_s27  ;;  %s250_s8 = scalar_lea.vmem (!%p1118_p6), [#allocation2], %s508_s15 }
  0x73   : > { %752 = dma.done.wait (%p1119_p3), %s247_s28, 128  }
  0x74   : > { %754 = vsyncadd (%p1119_p3), %s247_s28, 4294967168  ;;  %s255_s13 = sand.u32 1, %s844_s22   ;;  %s259_s26 = scalar_lea.vmem [#allocation5], %s508_s15 }
  0x75   : > { %s256_s16 = scalar_lea.sflag [#allocation6], %s255_s13 }
  0x76   : > { %756 = dma.done.wait (%p1119_p3), %s256_s16, 128  }
  0x77   : > { %758 = vsyncadd (%p1119_p3), %s256_s16, 4294967168  ;;  %p1120_p8 = scmp.eq.s32.totalorder %s844_s22, 0 }
  0x79   : > { %760 = dma.done.wait (%p1120_p8), [#allocation6], 128   ;;  %p1121_p12 = pmov %p1120_p8 }
  0x7a   : > { %v298_v0 = vld [vmem:[%s250_s8] sm:$0xff]  ;;  %v299_v3 = vld [vmem:[%s259_s26] sm:$0xff]  ;;  %s291_s24 = scalar_lea.vmem [#allocation8], %s994_s27  ;;  %s1013_s23 = scalar_lea.vmem [#allocation9], %s994_s27 }
  0x7b   : > { %762 = vsyncadd (%p1121_p12), [#allocation6], 4294967168  ;;  %585 = vlog2.f32 %v298_v0  ;;  %v303_v1 = vsub.f32 1.0, %v298_v0  ;;  %v308_v8 = vsub.f32 1.0, %v299_v3  ;;  %p1122_p13 = scmp.ne.s32.totalorder %s844_s22, 0 }
  0x7c   : > { %v324_v20 = vld [vmem:[%s1097_s3] sm:$0xff] (!%p1122_p13) }
  0x7d   : > { %587 = vlog2.f32 %v303_v1  ;;  %v328_v21 = vmul.f32 (!%p1122_p13), 1.442695, %v324_v20  ;;  %v323_v22 = vld [vmem:[#allocation7] sm:$0xff] (!%p1122_p13)  ;;  %v325_v23 = vadd.f32 (!%p1122_p13), 1.0, %v324_v20 }
  0x7e   : > { %v326_v24 = vmul.f32 (!%p1122_p13), %v323_v22, %v323_v22 }
  0x7f   : > { %589 = vpow2.f32 (!%p1122_p13), %v328_v21 }
  0x80   : > { %v327_v25 = vsub.f32 (!%p1122_p13), %v325_v23, %v326_v24 }
  0x85   : > { %v586_v2 = vpop.eup %585 }
  0x86   : > { %v301_v4 = vmul.f32 0.6931472, %v586_v2 }
  0x87   : > { %v588_v5 = vpop.eup %587 }
  0x88   : > { %v302_v6 = vmax.f32 %v301_v4, -100.0  ;;  %v305_v7 = vmul.f32 0.6931472, %v588_v5 }
  0x89   : > { %v590_v26 = vpop.eup (!%p1122_p13), %589 }
  0x8a   : > { %v306_v9 = vmax.f32 %v305_v7, -100.0  ;;  %v307_v10 = vmul.f32 %v302_v6, %v299_v3  ;;  %v330_v27 = vsub.f32 (!%p1122_p13), %v327_v25, %v590_v26 }
  0x8c   : > { %v309_v11 = vmul.f32 %v308_v8, %v306_v9  ;;  %v331_v28 = vrot.slane (!%p1122_p13), %v330_v27, 4 }
  0x8e   : > { %v310_v12 = vadd.f32 %v309_v11, %v307_v10  ;;  %v332_v29 = vadd.f32 (!%p1122_p13), %v331_v28, %v330_v27 }
  0x90   : > { %v311_v13 = vsub.f32 0.0, %v310_v12  ;;  %v333_v30 = vrot.slane (!%p1122_p13), %v332_v29, 2 }
  0x92   : > { %v312_v14 = vrot.slane %v311_v13, 4  ;;  %v334_v31 = vadd.f32 (!%p1122_p13), %v333_v30, %v332_v29 }
  0x94   : > { %v313_v15 = vadd.f32 %v312_v14, %v311_v13  ;;  %v335_v32 = vrot.slane (!%p1122_p13), %v334_v31, 1 }
  0x96   : > { %v314_v16 = vrot.slane %v313_v15, 2  ;;  %v336_v33 = vadd.f32 (!%p1122_p13), %v335_v32, %v334_v31 }
  0x98   : > { %v315_v17 = vadd.f32 %v314_v16, %v313_v15  ;;  %322 = sbr.rel (%p1122_p13) target bundleno = 159 (0x9f), region = 52  ;;  %337 = vst [vmem:[%s1013_s23] sm:$0x1] (!%p1122_p13), %v336_v33 }
  0x9a   : > { %v316_v18 = vrot.slane %v315_v17, 1 }
  0x9c   : > { %v317_v19 = vadd.f32 %v316_v18, %v315_v17 }
  0x9e   : > { %318 = vst [vmem:[%s291_s24] sm:$0x1] %v317_v19 }
  0x9f PF: > { %p1123_p0 = scmp.eq.s32.totalorder %s844_s22, 0 }
  0xa0   : > { %v790_v34 = vmov (!%p1123_p0), 0.0  }
  0xa1   : > { %341 = sbr.rel (%p1123_p0) target bundleno = 168 (0xa8), region = 56  ;;  %342 = vst [vmem:[%s1013_s23] sm:$0x1] (!%p1123_p0), %v790_v34 }
  0xa8 PF: > { %s513_s10 = sshll.u32 %s844_s22, 4  ;;  %s360_s7 = sshll.u32 %s291_s24, 4  ;;  %s361_s7 = int_to_ptr.vmem [resolvable:$true] %s360_s7 }
  0xa9   : > { %s1030_s9 = scalar_lea.hbm %s1098_s4, %s513_s10  ;;  %s344_s12 = scalar_lea.sflag [#allocation4], %s994_s27 }
  0xaa   : > { %s679_s17 = scalar_lea.vmem %s361_s7, 16  ;;  %p1124_p11 = scmp.ne.s32.totalorder %s1115_s30, 0 }
  0xab   : > { %p680_p5 = scmp.ne.s32.totalorder %s361_s7, %s679_s17  ;;  %s791_s15 = smov [#allocation8]  }
  0xac   : > { %s683_s28 = sshll.u32 %s791_s15, 4  ;;  %s684_s28 = int_to_ptr.vmem [resolvable:$false] %s683_s28 }
  0xad   : > { %p681_p1 = pnand %p680_p5, %p1124_p11  ;;  %s685_s8 = scalar_lea.vmem %s684_s28, 32 }
  0xae   : > { %p686_p7 = scmp.lt.s32.totalorder %s361_s7, %s684_s28  ;;  %p687_p4 = scmp.lt.s32.totalorder %s685_s8, %s679_s17 }
  0xaf   : > { %p682_p2 = pneg %p681_p1 }
  0xb0   : > { %p688_p9 = por %p687_p4, %p686_p7 }
  0xb2   : > { %p689_p10 = pnand %p688_p9, %p682_p2 }
  0xb4   : > { %692 = shalt.err (!%p689_p10)
}
  0xb5   : > { %s693_s13 = scalar_lea.hbm %s1030_s9, 16  ;;  %s697_s24 = scalar_lea.hbm %s1098_s4, 32 }
  0xb6   : > { %p694_p6 = scmp.ne.s32.totalorder %s1030_s9, %s693_s13  ;;  %p698_p12 = scmp.lt.u32.totalorder %s1030_s9, %s1098_s4 }
  0xb7   : > { %p699_p13 = scmp.lt.u32.totalorder %s697_s24, %s693_s13  ;;  %p701_p5 = scmp.lt.u32.totalorder %s693_s13, %s1030_s9 }
  0xb8   : > { %p695_p3 = pnand %p694_p6, %p1124_p11 }
  0xb9   : > { %p700_p0 = por %p699_p13, %p698_p12 }
  0xba   : > { %p696_p8 = pneg %p695_p3 }
  0xbb   : > { %p702_p1 = por %p701_p5, %p700_p0 }
  0xbd   : > { %p703_p2 = pnand %p702_p1, %p696_p8 }
  0xbf   : > { %706 = shalt.err (!%p703_p2)
}
  0xc0   : > { %525 = dma.vmem_to_hbm [thread:$0]  (%p1124_p11), %s361_s7, 16, %s1030_s9, %s344_s12  }
  0xc1   : > { %s1055_s17 = scalar_lea.hbm %s1099_s5, %s513_s10  ;;  %s373_s15 = sshll.u32 %s1013_s23, 4  ;;  %s374_s15 = int_to_ptr.vmem [resolvable:$true] %s373_s15 }
  0xc2   : > { %s348_s28 = scalar_lea.sflag [#allocation10], %s994_s27  ;;  %s707_s8 = scalar_lea.vmem %s374_s15, 16 }
  0xc3   : > { %p708_p7 = scmp.ne.s32.totalorder %s374_s15, %s707_s8  ;;  %s792_s13 = smov [#allocation9]  }
  0xc4   : > { %s711_s16 = sshll.u32 %s792_s13, 4  ;;  %s712_s16 = int_to_ptr.vmem [resolvable:$false] %s711_s16 }
  0xc5   : > { %p709_p4 = pnand %p708_p7, %p1124_p11  ;;  %s713_s26 = scalar_lea.vmem %s712_s16, 32 }
  0xc6   : > { %p714_p10 = scmp.lt.s32.totalorder %s374_s15, %s712_s16  ;;  %p715_p6 = scmp.lt.s32.totalorder %s713_s26, %s707_s8 }
  0xc7   : > { %p710_p9 = pneg %p709_p4 }
  0xc8   : > { %p716_p3 = por %p715_p6, %p714_p10 }
  0xca   : > { %p717_p8 = pnand %p716_p3, %p710_p9 }
  0xcc   : > { %720 = shalt.err (!%p717_p8)
}
  0xcd   : > { %s721_s22 = scalar_lea.hbm %s1055_s17, 16  ;;  %s725_s10 = scalar_lea.hbm %s1099_s5, 32 }
  0xce   : > { %p722_p12 = scmp.ne.s32.totalorder %s1055_s17, %s721_s22  ;;  %p726_p5 = scmp.lt.u32.totalorder %s1055_s17, %s1099_s5 }
  0xcf   : > { %p727_p1 = scmp.lt.u32.totalorder %s725_s10, %s721_s22  ;;  %p729_p7 = scmp.lt.u32.totalorder %s721_s22, %s1055_s17 }
  0xd0   : > { %p723_p13 = pnand %p722_p12, %p1124_p11 }
  0xd1   : > { %p728_p2 = por %p727_p1, %p726_p5 }
  0xd2   : > { %p724_p0 = pneg %p723_p13 }
  0xd3   : > { %p730_p4 = por %p729_p7, %p728_p2 }
  0xd5   : > { %p731_p9 = pnand %p730_p4, %p724_p0 }
  0xd7   : > { %734 = shalt.err (!%p731_p9)
}
  0xd8   : > { %526 = dma.vmem_to_hbm [thread:$0]  (%p1124_p11), %s374_s15, 16, %s1055_s17, %s348_s28  }
  0xd9 PF: > { %s385_s12 = sand.u32 1, %s773_s18   ;;  %p1125_p10 = scmp.ne.s32.totalorder %s1106_s25, 0 }
  0xda   : > { %p1126_p6 = scmp.ge.s32.totalorder %s785_s21, 2  ;;  %s386_s24 = scalar_lea.sflag [#allocation4], %s385_s12 }
  0xdc   : > { %p541_p3 = pnand %p1126_p6, %p1125_p10 }
  0xde   : > { %764 = dma.done.wait (!%p541_p3), %s386_s24, 16  }
  0xdf   : > { %766 = vsyncadd (!%p541_p3), %s386_s24, 4294967280  ;;  %s394_s11 = scalar_lea.sflag [#allocation10], %s385_s12 }
  0xe0   : > { %768 = dma.done.wait (!%p541_p3), %s394_s11, 16  }
  0xe1   : > { %770 = vsyncadd (!%p541_p3), %s394_s11, 4294967280  ;;  %s1127_s30 = sld [smem:[#allocation16_spill]]  ;;  %p25_p11 = scmp.ge.s32.totalorder %s872_s29, 4  }
  0xe2   : > { %s1128_s18 = smov %s777_s19  ;;  %s1129_s19 = smov %s781_s20 }
  0xe3   : > { %s1131_s21 = smov %s872_s29  ;;  %27 = sbr.rel (!%p25_p11) target bundleno = 11 (0xb), region = 123 }
  0xe7   : > { %s1130_s20 = smov %s1127_s30 }
  0xea   :  { %398 = vsyncpa [#allocation3], 1 }
  0xeb   :  { %400 = vsyncpa [#allocation3 + $0x1], 1 }
  0xec   :  { %401 = vsyncpa [#allocation6], 1 }
  0xed   :  { %403 = vsyncpa [#allocation6 + $0x1], 1 }
  0xee   :  { %404 = vsyncpa [#allocation4], 1 }
  0xef   :  { %406 = vsyncpa [#allocation4 + $0x1], 1 }
  0xf0   :  { %407 = vsyncpa [#allocation10], 1 }
  0xf1   :  { %409 = vsyncpa [#allocation10 + $0x1], 1 }

</bundles_post_ra>
